<compile_context>
chip_gen: v7x
topology: tpu7x:2x2x1
jax: 0.10.0
libtpu: 0.0.40
codegen_flags: <defaults>
</compile_context>

<pallas_src>
import functools

import jax
import jax.numpy as jnp
from jax import lax
from jax.experimental import pallas as pl
from jax.experimental.pallas import tpu as pltpu


def _mod_layer_norm_kernel(mod_ref, x_ref, o_ref, *, eps):
    # mod_ref: (1, 2, H)   row 0 = shift, row 1 = (1 + scale) for this batch elem
    # x_ref  : (1, tT, H)  input rows for this (batch, seq-tile)
    # o_ref  : (1, tT, H)  output rows
    x = x_ref[0].astype(jnp.float32)                        # (tT, H)
    h = x.shape[-1]

    # --- LayerNorm stats in one pass (f32): both reductions read the same x ---
    s = jnp.sum(x, axis=-1, keepdims=True)                  # (tT, 1)
    s2 = jnp.sum(x * x, axis=-1, keepdims=True)             # (tT, 1)
    mean = s * (1.0 / h)
    var = jnp.maximum(s2 * (1.0 / h) - mean * mean, 0.0)
    inv_std = lax.rsqrt(var + eps)

    # --- modulate: (x - mean) * inv_std * (1 + scale) + shift ---
    m = mod_ref[0].astype(jnp.float32)                      # (2, H)
    shift = m[0:1, :]                                       # (1, H)
    scale1 = m[1:2, :]                                      # (1, H)
    y = (x - mean) * inv_std * scale1 + shift
    o_ref[0] = y.astype(o_ref.dtype)


def _vmem_capacity_bytes():
    """Generation-aware VMEM capacity (64 MiB on v7x, 128 MiB on v5e/v6e)."""
    try:
        return int(pltpu.get_tpu_info().vmem_capacity_bytes)
    except Exception:
        return 64 << 20  # conservative fallback (v7x per-TC VMEM)


def _pick_t_tile(B, T, H, itemsize, vmem_budget,
                 target_step_bytes=6 << 20, min_steps=8):
    """Pick the sequence tile from a per-step byte budget, grid-point floor,
    and VMEM budget; round to a multiple of 8 (or the full T)."""
    bytes_per_row = 2 * H * itemsize                # x in + out per row
    tT = max(8, int(target_step_bytes // bytes_per_row))

    # Enough grid points for 2-TensorCore sharding / pipelining on small B.
    if B * pl.cdiv(T, tT) < min_steps:
        want_nt = -(-min_steps // B)                # ceil(min_steps / B)
        tT = max(8, -(-T // want_nt))               # ceil(T / want_nt)

    # VMEM need: double-buffered x + out tiles (native dtype), explicit f32
    # intermediate headroom (~2 tile-strips worth), mod vectors, slack.
    def vmem_needed(t):
        return (2 * 2 * t * H * itemsize            # x + out, double buffered
                + 2 * t * H * 4                     # f32 intermediates headroom
                + 2 * 2 * H * 4                     # (1,2,H) mod, double buffered
                + (2 << 20))                        # slack

    while tT > 8 and vmem_needed(tT) > vmem_budget:
        tT //= 2

    # (8, 128) block rule: second-to-last block dim must be a multiple of 8
    # unless it equals the full array dim.
    if tT >= T:
        tT = T
    else:
        tT = max(8, (tT // 8) * 8)
    return tT, vmem_needed(tT)


def mod_layer_norm(x, c, w_t, bias, *, eps=1e-6, target_step_bytes=6 << 20):
    """x: (B, T, H), c: (B, H), w_t: (H, 2H), bias: (2H,) -> (B, T, H)."""
    B, T, H = x.shape
    assert c.shape == (B, H)
    assert w_t.shape == (H, 2 * H)
    assert bias.shape == (2 * H,)

    # --- adaLN modulation hoisted to XLA: one batched (B,H)@(H,2H) matmul ---
    c_f32 = c.astype(jnp.float32)
    c_act = c_f32 * jax.nn.sigmoid(c_f32)                       # SiLU
    mod = c_act @ w_t.astype(jnp.float32) + bias.astype(jnp.float32)  # (B, 2H)
    shift = mod[:, :H]
    scale1 = 1.0 + mod[:, H:]
    mod_packed = jnp.stack([shift, scale1], axis=1)             # (B, 2, H) f32

    # --- tiling + VMEM budget (generation-aware) ---
    itemsize = jnp.dtype(x.dtype).itemsize
    vmem_cap = _vmem_capacity_bytes()
    vmem_budget = int(vmem_cap * 3 // 4)            # ~48 MiB v7x / ~96 MiB v5e,v6e
    tT, vmem_needed = _pick_t_tile(B, T, H, itemsize, vmem_budget,
                                   target_step_bytes=target_step_bytes)
    n_t = pl.cdiv(T, tT)
    vmem_bytes = int(min(max(vmem_needed, 8 << 20), vmem_budget))

    kernel = functools.partial(_mod_layer_norm_kernel, eps=eps)

    return pl.pallas_call(
        kernel,
        out_shape=jax.ShapeDtypeStruct((B, T, H), x.dtype),
        grid_spec=pltpu.PrefetchScalarGridSpec(
            num_scalar_prefetch=0,
            grid=(B, n_t),
            in_specs=[
                pl.BlockSpec((1, 2, H), lambda b, t: (b, 0, 0)),    # shift / 1+scale
                pl.BlockSpec((1, tT, H), lambda b, t: (b, t, 0)),   # x
            ],
            out_specs=pl.BlockSpec((1, tT, H), lambda b, t: (b, t, 0)),
        ),
        compiler_params=pltpu.CompilerParams(
            dimension_semantics=("parallel", "parallel"),
            vmem_limit_bytes=vmem_bytes),
    )(mod_packed, x)


def mod_layer_norm_ref(x, c, w_t, bias, *, eps=1e-6):
    """Pure-JAX reference matching the PyTorch module."""
    c_act = c * jax.nn.sigmoid(c)
    mod = c_act @ w_t + bias
    H = x.shape[-1]
    shift, scale = mod[:, :H], mod[:, H:]
    mean = jnp.mean(x, axis=-1, keepdims=True)
    var = jnp.mean((x - mean) ** 2, axis=-1, keepdims=True)
    xn = (x - mean) / jnp.sqrt(var + eps)
    return xn * (1.0 + scale[:, None, :]) + shift[:, None, :]


if __name__ == "__main__":
    key = jax.random.PRNGKey(0)

    # (1) toy shape matching the module's minimal config;
    # (2) lane-dense H=128 with a ragged sequence (exercises T tiling + cdiv
    #     + the grid-point floor for small B).
    for (B, T, H) in [(2, 8, 32), (2, 1040, 128)]:
        kx, kc, kw, kb, key = jax.random.split(key, 5)

        x = jax.random.normal(kx, (B, T, H), dtype=jnp.float32)
        c = jax.random.normal(kc, (B, H), dtype=jnp.float32)

        # PyTorch Linear weight is (2H, H); we keep the transposed (H, 2H)
        # layout so the modulation computes SiLU(c) @ W^T directly.
        w_t = (jax.random.normal(kw, (H, 2 * H), dtype=jnp.float32)
               * (1.0 / jnp.sqrt(H)))
        bias = jax.random.normal(kb, (2 * H,), dtype=jnp.float32) * 0.1

        out = jax.block_until_ready(mod_layer_norm(x, c, w_t, bias))
        ref = mod_layer_norm_ref(x, c, w_t, bias)

        assert out.shape == (B, T, H)
        err = float(jnp.max(jnp.abs(out - ref)))
        assert jnp.allclose(out, ref, atol=1e-4, rtol=1e-4), err

    print("KERNEL_OK")
</pallas_src>

<mosaic_0001>
module attributes {stable_mosaic.version = 11 : i64} {
  func.func @_mod_layer_norm_kernel(%arg0: i32, %arg1: i32, %arg2: memref<1x2x32xf32, #tpu.memory_space<vmem>>, %arg3: memref<1x8x32xf32, #tpu.memory_space<vmem>>, %arg4: memref<1x8x32xf32, #tpu.memory_space<vmem>>) attributes {dimension_semantics = [#tpu.dimension_semantics<parallel>, #tpu.dimension_semantics<parallel>], iteration_bounds = array<i64: 2, 1>, scalar_prefetch = 0 : i64, scratch_operands = 0 : i64, tpu.core_type = #tpu.core_type<tc>, window_params = [{transform_indices = @transform_0, window_bounds = array<i64: 1, 2, 32>}, {transform_indices = @transform_1, window_bounds = array<i64: 1, 8, 32>}, {transform_indices = @transform_2, window_bounds = array<i64: 1, 8, 32>}]} {
    %c0 = arith.constant 0 : index
    %c0_0 = arith.constant 0 : index
    %c0_1 = arith.constant 0 : index
    %0 = vector.load %arg3[%c0, %c0_0, %c0_1] : memref<1x8x32xf32, #tpu.memory_space<vmem>>, vector<1x8x32xf32>
    %1 = vector.shape_cast %0 : vector<1x8x32xf32> to vector<8x32xf32>
    %cst = arith.constant dense<0.000000e+00> : vector<8xf32>
    %2 = vector.multi_reduction <add>, %1, %cst [1] : vector<8x32xf32> to vector<8xf32>
    %3 = vector.shape_cast %2 : vector<8xf32> to vector<8x1xf32>
    %4 = arith.mulf %1, %1 : vector<8x32xf32>
    %cst_2 = arith.constant dense<0.000000e+00> : vector<8xf32>
    %5 = vector.multi_reduction <add>, %4, %cst_2 [1] : vector<8x32xf32> to vector<8xf32>
    %6 = vector.shape_cast %5 : vector<8xf32> to vector<8x1xf32>
    %cst_3 = arith.constant 3.125000e-02 : f32
    %7 = vector.broadcast %cst_3 : f32 to vector<8x1xf32>
    %8 = arith.mulf %3, %7 : vector<8x1xf32>
    %cst_4 = arith.constant 3.125000e-02 : f32
    %9 = vector.broadcast %cst_4 : f32 to vector<8x1xf32>
    %10 = arith.mulf %6, %9 : vector<8x1xf32>
    %11 = arith.mulf %8, %8 : vector<8x1xf32>
    %12 = arith.subf %10, %11 : vector<8x1xf32>
    %cst_5 = arith.constant 0.000000e+00 : f32
    %13 = vector.broadcast %cst_5 : f32 to vector<8x1xf32>
    %14 = arith.maximumf %12, %13 : vector<8x1xf32>
    %cst_6 = arith.constant 9.99999997E-7 : f32
    %15 = vector.broadcast %cst_6 : f32 to vector<8x1xf32>
    %16 = arith.addf %14, %15 : vector<8x1xf32>
    %17 = math.rsqrt %16 : vector<8x1xf32>
    %c0_7 = arith.constant 0 : index
    %c0_8 = arith.constant 0 : index
    %c0_9 = arith.constant 0 : index
    %18 = vector.load %arg2[%c0_7, %c0_8, %c0_9] : memref<1x2x32xf32, #tpu.memory_space<vmem>>, vector<1x2x32xf32>
    %19 = vector.shape_cast %18 : vector<1x2x32xf32> to vector<2x32xf32>
    %20 = vector.extract_strided_slice %19 {offsets = [0, 0], sizes = [1, 32], strides = [1, 1]} : vector<2x32xf32> to vector<1x32xf32>
    %21 = vector.extract_strided_slice %19 {offsets = [1, 0], sizes = [1, 32], strides = [1, 1]} : vector<2x32xf32> to vector<1x32xf32>
    %22 = vector.broadcast %8 : vector<8x1xf32> to vector<8x32xf32>
    %23 = arith.subf %1, %22 : vector<8x32xf32>
    %24 = vector.broadcast %17 : vector<8x1xf32> to vector<8x32xf32>
    %25 = arith.mulf %23, %24 : vector<8x32xf32>
    %26 = vector.broadcast %21 : vector<1x32xf32> to vector<8x32xf32>
    %27 = arith.mulf %25, %26 : vector<8x32xf32>
    %28 = vector.broadcast %20 : vector<1x32xf32> to vector<8x32xf32>
    %29 = arith.addf %27, %28 : vector<8x32xf32>
    %c0_10 = arith.constant 0 : index
    %c0_11 = arith.constant 0 : index
    %c0_12 = arith.constant 0 : index
    %30 = vector.load %arg4[%c0_10, %c0_11, %c0_12] : memref<1x8x32xf32, #tpu.memory_space<vmem>>, vector<1x8x32xf32>
    %31 = vector.shape_cast %30 : vector<1x8x32xf32> to vector<8x32xf32>
    %32 = vector.shape_cast %29 : vector<8x32xf32> to vector<1x8x32xf32>
    tpu.vector_store %arg4[%c0_10, %c0_11, %c0_12], %32 {strides = array<i32>} : memref<1x8x32xf32, #tpu.memory_space<vmem>>, vector<1x8x32xf32>,
    return
  }
  func.func @transform_0(%arg0: i32, %arg1: i32) -> (i32, i32, i32) {
    %c0_i32 = arith.constant 0 : i32
    %c0_i32_0 = arith.constant 0 : i32
    %c0_i32_1 = arith.constant 0 : i32
    return %arg0, %c0_i32, %c0_i32_0 : i32, i32, i32
  }
  func.func @transform_1(%arg0: i32, %arg1: i32) -> (i32, i32, i32) {
    %c0_i32 = arith.constant 0 : i32
    %c0_i32_0 = arith.constant 0 : i32
    return %arg0, %arg1, %c0_i32 : i32, i32, i32
  }
  func.func @transform_2(%arg0: i32, %arg1: i32) -> (i32, i32, i32) {
    %c0_i32 = arith.constant 0 : i32
    %c0_i32_0 = arith.constant 0 : i32
    return %arg0, %arg1, %c0_i32 : i32, i32, i32
  }
}

</mosaic_0001>

<bundles_post_ra>
// kernel: tpu_custom_call.1
= control target key start
LH: loop header
LB: loop body
LE: loop exit
PB: predicated region body
PF: predicated region fallthrough
CT: control target
= control target key end

     0   :  { %7 = vsyncpa [#allocation3], 0  ;;  %s834_s0 = inlined_call_operand.hbm [shape: f32[2,2,32], index: 0, kind: input, shape index: {}]   ;;  %s835_s1 = inlined_call_operand.hbm [shape: f32[2,8,32], index: 1, kind: input, shape index: {}]   ;;  %s836_s2 = inlined_call_operand.hbm [shape: f32[2,8,32], index: 2, kind: output, shape index: {}]  }
   0x1   :  { %9 = vsyncpa [#allocation3 + $0x1], 0 }
   0x2   :  { %10 = vsyncpa [#allocation6], 0 }
   0x3   :  { %12 = vsyncpa [#allocation6 + $0x1], 0 }
   0x4   :  { %13 = vsyncpa [#allocation4], 0 }
   0x5   :  { %15 = vsyncpa [#allocation4 + $0x1], 0  ;;  %s612_s9 = smov 0   ;;  %s614_s10 = smov 0  }
   0x6   :  { %s616_s11 = smov 0   ;;  %s618_s12 = smov 0  }
   0x7   :  { %s620_s13 = smov 0   ;;  %s622_s14 = smov 0  }
   0x8 LB: > { %s361_s15 = sadd.s32 4294967295, %s592_s14   ;;  %s362_s16 = sadd.s32 4294967294, %s592_s14   ;;  %s592_s14 = sphi %s622_s14, %s21_s14   ;;  %s588_s13 = sphi %s620_s13, %s856_s13   ;;  %s584_s12 = sphi %s618_s12, %s855_s12   ;;  %s580_s11 = sphi %s616_s11, %s854_s11   ;;  %s576_s10 = sphi %s614_s10, %s853_s10   ;;  %s572_s9 = sphi %s612_s9, %s852_s9  }
   0x9   : > { %s33_s17 = sadd.s32 1, %s588_s13  ;;  %s40_s18 = sadd.s32 1, %s580_s11 }
   0xa   : > { %p35_p0 = scmp.ge.s32.totalorder %s33_s17, 2  ;;  %p47_p1 = scmp.ne.s32.totalorder %s580_s11, %s576_s10 }
   0xb   : > { %p48_p2 = scmp.eq.s32.totalorder %s592_s14, 0  ;;  %p53_p3 = scmp.ne.s32.totalorder %s576_s10, %s572_s9 }
   0xc   : > { %s858_s17 = smov (%p35_p0, %s33_s17), 0  ;;  %p54_p5 = scmp.eq.s32.totalorder %s361_s15, 0 }
   0xd   : > { %p653_p4 = por %p48_p2, %p47_p1  ;;  %s37_s20 = ssub.s32 %s588_s13, %s858_s17 }
   0xe   : > { %p107_p6 = scmp.eq.s32.totalorder %s361_s15, 1  ;;  %p38_p7 = scmp.eq.s32.totalorder %s37_s20, 0 }
   0xf   : > { %p659_p8 = por %p54_p5, %p53_p3  ;;  %p113_p10 = scmp.eq.s32.totalorder %s362_s16, 1 }
  0x10   : > { %p663_p9 = por %p107_p6, %p47_p1  ;;  %p394_p13 = scmp.lt.s32.totalorder %s592_s14, 2 }
  0x11   : > { %s840_s21 = scalar_select %p659_p8, 1, 0 }
  0x12   : > { %s841_s22 = scalar_select %p663_p9, 1, 0 }
  0x13   : > { %s668_s23 = scalar_select %p38_p7, %s580_s11, %s40_s18  }
  0x14   : > { %p670_p11 = por %p113_p10, %p53_p3  ;;  %s677_s25 = sand.u32 1, %s580_s11  }
  0x15   : > { %s365_s26 = sshll.u32 %s677_s25, 1  ;;  %s366_s27 = sshll.u32 %s588_s13, 5 }
  0x16   : > { %s842_s24 = scalar_select %p670_p11, 1, 0 }
  0x17   : > { %s684_s30 = scalar_lea.hbm %s834_s0, %s366_s27  ;;  %s137_s3 = scalar_lea.vmem [#allocation2], %s365_s26 }
  0x18   : > { %s144_s4 = sshll.u32 %s137_s3, 4  ;;  %p690_p0 = pnand %p394_p13, %p653_p4  ;;  %s686_s4 = int_to_ptr.vmem [resolvable:$true] %s144_s4 }
  0x19   : > { %s134_s6 = scalar_lea.sflag [#allocation3], %s677_s25  ;;  %s446_s7 = scalar_lea.hbm %s684_s30, 32 }
  0x1a   : > { %p447_p3 = scmp.ne.s32.totalorder %s684_s30, %s446_s7  ;;  %p448_p5 = pneg %p690_p0 }
  0x1b   : > { %s451_s16 = scalar_lea.hbm %s834_s0, 64  ;;  %p452_p4 = scmp.lt.u32.totalorder %s684_s30, %s834_s0 }
  0x1c   : > { %p449_p6 = pnand %p448_p5, %p447_p3  ;;  %p453_p10 = scmp.lt.u32.totalorder %s451_s16, %s446_s7 }
  0x1d   : > { %p455_p12 = scmp.lt.u32.totalorder %s446_s7, %s684_s30 }
  0x1e   : > { %p450_p7 = pneg %p449_p6  ;;  %p454_p13 = por %p453_p10, %p452_p4 }
  0x20   : > { %p456_p1 = por %p455_p12, %p454_p13 }
  0x22   : > { %p457_p2 = pnand %p456_p1, %p450_p7 }
  0x24   : > { %460 = shalt.err (!%p457_p2)
}
  0x25   : > { %s461_s20 = scalar_lea.vmem %s686_s4, 32  ;;  %s594_s26 = smov [#allocation2]  }
  0x26   : > { %p462_p3 = scmp.ne.s32.totalorder %s686_s4, %s461_s20  ;;  %s466_s27 = sshll.u32 %s594_s26, 4  ;;  %s467_s27 = int_to_ptr.vmem [resolvable:$false] %s466_s27 }
  0x27   : > { %s468_s28 = scalar_lea.vmem %s467_s27, 64  ;;  %p469_p9 = scmp.lt.s32.totalorder %s686_s4, %s467_s27 }
  0x28   : > { %p464_p6 = pnand %p462_p3, %p448_p5  ;;  %p470_p4 = scmp.lt.s32.totalorder %s468_s28, %s461_s20 }
  0x2a   : > { %p465_p11 = pneg %p464_p6  ;;  %p471_p10 = por %p470_p4, %p469_p9 }
  0x2c   : > { %p472_p12 = pnand %p471_p10, %p465_p11 }
  0x2e   : > { %475 = shalt.err (!%p472_p12)
}
  0x2f   : > { %386 = dma.hbm_to_vmem [thread:$0]  (!%p690_p0), %s684_s30, 32, %s686_s4, %s134_s6  }
  0x30   : > { %p844_p1 = scmp.lt.s32.totalorder %s592_s14, 3  ;;  %p845_p2 = scmp.ge.s32.totalorder %s592_s14, 1 }
  0x31   : > { %s367_s3 = sshll.u32 %s677_s25, 3  ;;  %s368_s7 = sshll.u32 %s588_s13, 7 }
  0x32   : > { %p726_p7 = pnand %p845_p2, %p844_p1  ;;  %s735_s16 = scalar_lea.hbm %s835_s1, %s368_s7 }
  0x33   : > { %s155_s18 = scalar_lea.vmem [#allocation5], %s367_s3  ;;  %s152_s30 = scalar_lea.sflag [#allocation6], %s677_s25 }
  0x34   : > { %s846_s29 = scalar_select %p726_p7, 1, 0 }
  0x35   : > { %s163_s19 = sshll.u32 %s155_s18, 4  ;;  %s476_s4 = scalar_lea.hbm %s735_s16, 128  ;;  %s164_s19 = int_to_ptr.vmem [resolvable:$true] %s163_s19 }
  0x36   : > { %p477_p9 = scmp.ne.s32.totalorder %s735_s16, %s476_s4  ;;  %s481_s26 = scalar_lea.hbm %s835_s1, 256 }
  0x37   : > { %p482_p3 = scmp.lt.u32.totalorder %s735_s16, %s835_s1  ;;  %p483_p6 = scmp.lt.u32.totalorder %s481_s26, %s476_s4 }
  0x38   : > { %p479_p11 = pnand %p477_p9, %p448_p5  ;;  %p485_p10 = scmp.lt.u32.totalorder %s476_s4, %s735_s16 }
  0x39   : > { %p484_p4 = por %p483_p6, %p482_p3 }
  0x3a   : > { %p480_p13 = pneg %p479_p11 }
  0x3b   : > { %p486_p12 = por %p485_p10, %p484_p4 }
  0x3d   : > { %p487_p1 = pnand %p486_p12, %p480_p13 }
  0x3f   : > { %490 = shalt.err (!%p487_p1)
}
  0x40   : > { %s491_s25 = scalar_lea.vmem %s164_s19, 128  ;;  %s595_s3 = smov [#allocation5]  }
  0x41   : > { %p492_p2 = scmp.ne.s32.totalorder %s164_s19, %s491_s25  ;;  %s496_s7 = sshll.u32 %s595_s3, 4  ;;  %s497_s7 = int_to_ptr.vmem [resolvable:$false] %s496_s7 }
  0x42   : > { %s498_s8 = scalar_lea.vmem %s497_s7, 256  ;;  %p499_p8 = scmp.lt.s32.totalorder %s164_s19, %s497_s7 }
  0x43   : > { %p494_p9 = pnand %p492_p2, %p448_p5  ;;  %p500_p7 = scmp.lt.s32.totalorder %s498_s8, %s491_s25 }
  0x45   : > { %p495_p11 = pneg %p494_p9  ;;  %p501_p3 = por %p500_p7, %p499_p8 }
  0x47   : > { %p502_p6 = pnand %p501_p3, %p495_p11 }
  0x49   : > { %505 = shalt.err (!%p502_p6)
}
  0x4a   : > { %389 = dma.hbm_to_vmem [thread:$0]  (!%p690_p0), %s735_s16, 128, %s164_s19, %s152_s30  }
  0x4b   : > { %p847_p13 = scmp.ne.s32.totalorder %s846_s29, 0 }
  0x4c   : > { %s760_s15 = sand.u32 (!%p847_p13), 1, %s576_s10   ;;  %p848_p5 = scmp.ne.s32.totalorder (!%p847_p13), %s840_s21, 0 }
  0x4d   : > { %172 = sbr.rel (%p847_p13) target bundleno = 275 (0x113), region = 28  ;;  %s370_s18 = sshll.u32 (!%p847_p13), %s760_s15, 1 }
  0x4e   : > { %s175_s4 = scalar_lea.sflag (!%p847_p13), [#allocation3], %s760_s15  ;;  %s178_s6 = scalar_lea.vmem (!%p847_p13), [#allocation2], %s370_s18 }
  0x54   : > { %559 = dma.done.wait (%p848_p5), %s175_s4, 32  }
  0x55   : > { %561 = vsyncadd (%p848_p5), %s175_s4, 4294967264  ;;  %s371_s5 = sshll.u32 %s760_s15, 3  ;;  %s184_s29 = scalar_lea.sflag [#allocation6], %s760_s15 }
  0x56   : > { %s187_s16 = scalar_lea.vmem [#allocation5], %s371_s5 }
  0x57   : > { %563 = dma.done.wait (%p848_p5), %s184_s29, 128  }
  0x58   : > { %565 = vsyncadd (%p848_p5), %s184_s29, 4294967168  ;;  %vm214_vm0 = vcmask 261120   ;;  %v213_v0 = vld [vmem:[%s187_s16] sm:$0xff]  ;;  %v232_v11 = vlaneseq  ;;  %v229_v15 = vld [vmem:[%s178_s6] sm:$0x3]  ;;  %s374_s21 = sshll.u32 %s584_s12, 7 }
  0x59   : > { %v215_v1 = vsel %vm214_vm0, %v213_v0, 0.0  ;;  %v218_v2 = vmul.f32 %v213_v0, %v213_v0  ;;  %s212_s19 = scalar_lea.vmem [#allocation7], %s371_s5  ;;  %s784_s27 = scalar_lea.hbm %s836_s2, %s374_s21 }
  0x5a   : > { %216 = vadd.xlane.f32.xlu0 %v215_v1  ;;  %v233_v13 = vshrl.u32 %v232_v11, 7  ;;  %s258_s30 = sshll.u32 %s212_s19, 4  ;;  %s244_s28 = scalar_lea.sflag [#allocation4], %s760_s15  ;;  %s786_s30 = int_to_ptr.vmem [resolvable:$true] %s258_s30 }
  0x5b   : > { %v219_v3 = vsel %vm214_vm0, %v218_v2, 0.0  ;;  %s506_s25 = scalar_lea.vmem %s786_s30, 128  ;;  %p849_p0 = scmp.ne.s32.totalorder %s841_s22, 0 }
  0x5c   : > { %v234_v14 = vsub.s32 1, %v233_v13  ;;  %v239_v16 = vsub.s32 0, %v233_v13  ;;  %p507_p8 = scmp.ne.s32.totalorder %s786_s30, %s506_s25  ;;  %s596_s12 = smov [#allocation7]  }
  0x5d   : > { %s510_s3 = sshll.u32 %s596_s12, 4  ;;  %s511_s3 = int_to_ptr.vmem [resolvable:$false] %s510_s3 }
  0x5e   : > { %220 = vadd.xlane.f32.xlu0 %v219_v3  ;;  %v235_v18 = vrot.slane %v229_v15, %v234_v14  ;;  %v240_v21 = vrot.slane %v229_v15, %v239_v16  ;;  %p508_p7 = pnand %p507_p8, %p849_p0  ;;  %s512_s7 = scalar_lea.vmem %s511_s3, 256 }
  0x5f   : > { %p513_p10 = scmp.lt.s32.totalorder %s786_s30, %s511_s3  ;;  %p514_p12 = scmp.lt.s32.totalorder %s512_s7, %s506_s25 }
  0x60   : > { %p509_p4 = pneg %p508_p7 }
  0x61   : > { %p515_p1 = por %p514_p12, %p513_p10 }
  0x63   : > { %p516_p2 = pnand %p515_p1, %p509_p4 }
  0xe7   : > { %v217_v4 = vpop.xlane.xlu0 %216 }
  0xe8   : > { %v222_v5 = vmul.f32 0.03125, %v217_v4 }
  0xea   : > { %v224_v7 = vmul.f32 %v222_v5, %v222_v5  ;;  %v230_v17 = vsub.f32 %v213_v0, %v222_v5 }
  0xeb   : > { %v221_v6 = vpop.xlane.xlu0 %220 }
  0xec   : > { %v223_v8 = vmul.f32 0.03125, %v221_v6 }
  0xee   : > { %v225_v9 = vsub.f32 %v223_v8, %v224_v7 }
  0xf0   : > { %v226_v10 = vmax.f32 %v225_v9, 0.0 }
  0xf2   : > { %v227_v12 = vadd.f32 1e-06, %v226_v10 }
  0xf4   : > { %444 = vrsqrt.f32 %v227_v12 }
  0xfe   : > { %v445_v19 = vpop.eup %444 }
  0xff   : > { %v231_v20 = vmul.f32 %v445_v19, %v230_v17 }
 0x101   : > { %v236_v22 = vmul.f32 %v235_v18, %v231_v20 }
 0x103   : > { %v241_v23 = vadd.f32 %v240_v21, %v236_v22 }
 0x105   : > { %242 = vst.msk [vmem:[%s212_s19] sm:$0xff] %vm214_vm0, %v241_v23 }
 0x106   : > { %519 = shalt.err (!%p516_p2)
}
 0x107   : > { %s520_s8 = scalar_lea.hbm %s784_s27, 128  ;;  %s524_s4 = scalar_lea.hbm %s836_s2, 256 }
 0x108   : > { %p521_p9 = scmp.ne.s32.totalorder %s784_s27, %s520_s8  ;;  %p525_p6 = scmp.lt.u32.totalorder %s784_s27, %s836_s2 }
 0x109   : > { %p526_p13 = scmp.lt.u32.totalorder %s524_s4, %s520_s8  ;;  %p528_p8 = scmp.lt.u32.totalorder %s520_s8, %s784_s27 }
 0x10a   : > { %p522_p11 = pnand %p521_p9, %p849_p0 }
 0x10b   : > { %p527_p5 = por %p526_p13, %p525_p6 }
 0x10c   : > { %p523_p3 = pneg %p522_p11 }
 0x10d   : > { %p529_p7 = por %p528_p8, %p527_p5 }
 0x10f   : > { %p530_p4 = pnand %p529_p7, %p523_p3 }
 0x111   : > { %533 = shalt.err (!%p530_p4)
}
 0x112   : > { %381 = dma.vmem_to_hbm [thread:$0]  (%p849_p0), %s786_s30, 128, %s784_s27, %s244_s28  }
 0x113 PF: > { %s270_s29 = sand.u32 1, %s572_s9   ;;  %p850_p10 = scmp.ne.s32.totalorder %s842_s24, 0 }
 0x114   : > { %p851_p12 = scmp.ge.s32.totalorder %s592_s14, 2  ;;  %s271_s16 = scalar_lea.sflag [#allocation4], %s270_s29 }
 0x116   : > { %p391_p1 = pnand %p851_p12, %p850_p10 }
 0x118   : > { %567 = dma.done.wait (!%p391_p1), %s271_s16, 128  }
 0x119   : > { %569 = vsyncadd (!%p391_p1), %s271_s16, 4294967168  ;;  %s21_s14 = sadd.s32 1, %s592_s14   ;;  %s852_s9 = smov %s576_s10 }
 0x11a   : > { %p18_p2 = scmp.ge.s32.totalorder %s21_s14, 4   ;;  %s853_s10 = smov %s580_s11 }
 0x11b   : > { %s854_s11 = smov %s668_s23  ;;  %s855_s12 = smov %s588_s13 }
 0x11c   : > { %s856_s13 = smov %s858_s17  ;;  %20 = sbr.rel (!%p18_p2) target bundleno = 8 (0x8), region = 86 }
 0x123   :  { %276 = vsyncpa [#allocation3], 1 }
 0x124   :  { %278 = vsyncpa [#allocation3 + $0x1], 1 }
 0x125   :  { %279 = vsyncpa [#allocation6], 1 }
 0x126   :  { %281 = vsyncpa [#allocation6 + $0x1], 1 }
 0x127   :  { %282 = vsyncpa [#allocation4], 1 }
 0x128   :  { %284 = vsyncpa [#allocation4 + $0x1], 1 }

</bundles_post_ra>
